<compile_context>
chip_gen: v6e
topology: v6e:2x2x1
jax: 0.10.0
libtpu: 0.0.40
codegen_flags: <defaults>
</compile_context>

<pallas_src>
import jax
import jax.numpy as jnp
from jax.experimental import pallas as pl
from jax.experimental.pallas import tpu as pltpu


_TB_MAX = 512   # default max batch-tile rows (512+ is already at the HBM roofline knee)


def _round_up(x, m):
    return ((x + m - 1) // m) * m


# --------------------------------------------------------------------------------------
# Kernel
# --------------------------------------------------------------------------------------
def _critic_kernel(obs_ref, act_ref,
                   w1o_ref, w1a_ref, b1_ref,
                   w2a_ref, b2a_ref, w2b_ref, b2b_ref,
                   w3a_ref, b3a_ref, w3b_ref, b3b_ref,
                   q1_ref, q2_ref):
    mid = w2a_ref.shape[0]
    wdt = w2a_ref.dtype                       # bf16 compute dtype for the MXU

    # Layer 1 (both nets fused on the output axis): split-K over obs / act rows of W1,
    # so the wrapper never materialises cat([obs, act]) in HBM.
    h1 = (jnp.dot(obs_ref[...], w1o_ref[...], preferred_element_type=jnp.float32)
          + jnp.dot(act_ref[...], w1a_ref[...], preferred_element_type=jnp.float32)
          + b1_ref[...])
    h1 = jnp.maximum(h1, 0.0)                 # f32 bias-add / ReLU (v5e-safe)

    # Per-net layers 2 and 3 (no block-diagonal zero MACs).
    h1a = h1[:, :mid].astype(wdt)
    h1b = h1[:, mid:].astype(wdt)

    h2a = jnp.maximum(
        jnp.dot(h1a, w2a_ref[...], preferred_element_type=jnp.float32) + b2a_ref[...], 0.0)
    h2b = jnp.maximum(
        jnp.dot(h1b, w2b_ref[...], preferred_element_type=jnp.float32) + b2b_ref[...], 0.0)

    q1_ref[...] = (jnp.dot(h2a.astype(wdt), w3a_ref[...],
                           preferred_element_type=jnp.float32)
                   + b3a_ref[...]).astype(q1_ref.dtype)
    q2_ref[...] = (jnp.dot(h2b.astype(wdt), w3b_ref[...],
                           preferred_element_type=jnp.float32)
                   + b3b_ref[...]).astype(q2_ref.dtype)


# --------------------------------------------------------------------------------------
# Parameter preparation (hoisted out of the per-call forward path)
# --------------------------------------------------------------------------------------
def prepare_critic_params(params, obs_dim, compute_dtype=jnp.bfloat16):
    """One-time (per parameter update) weight preparation.

    Weights are stored (in_features, out_features), biases (1, out_features).  W1 of the
    two nets is concatenated on its output axis and split into obs-rows / act-rows (for
    the wide split-K layer-1); W2/W3 and all biases stay per-net.  Matmul weights are
    cast to compute_dtype, biases stay float32.
    """
    p1, p2 = params["net1"], params["net2"]
    w1 = jnp.concatenate([p1["w1"], p2["w1"]], axis=1)          # (obs+act, 2*mid)
    return {
        "w1o": w1[:obs_dim].astype(compute_dtype),              # (obs_dim, 2*mid)
        "w1a": w1[obs_dim:].astype(compute_dtype),              # (act_dim, 2*mid)
        "b1": jnp.concatenate([p1["b1"], p2["b1"]], axis=1).astype(jnp.float32),
        "w2_1": p1["w2"].astype(compute_dtype),
        "b2_1": p1["b2"].astype(jnp.float32),
        "w2_2": p2["w2"].astype(compute_dtype),
        "b2_2": p2["b2"].astype(jnp.float32),
        "w3_1": p1["w3"].astype(compute_dtype),
        "b3_1": p1["b3"].astype(jnp.float32),
        "w3_2": p2["w3"].astype(compute_dtype),
        "b3_2": p2["b3"].astype(jnp.float32),
    }


# --------------------------------------------------------------------------------------
# Forward
# --------------------------------------------------------------------------------------
def _xla_forward(obs, act, p):
    """Plain-XLA path (same math/dtypes as the kernel) for tiny batches."""
    wdt = p["w1o"].dtype
    mid = p["w2_1"].shape[0]
    h1 = jnp.maximum(
        jnp.dot(obs.astype(wdt), p["w1o"], preferred_element_type=jnp.float32)
        + jnp.dot(act.astype(wdt), p["w1a"], preferred_element_type=jnp.float32)
        + p["b1"], 0.0)

    def head(h, w2, b2, w3, b3):
        h2 = jnp.maximum(
            jnp.dot(h.astype(wdt), w2, preferred_element_type=jnp.float32) + b2, 0.0)
        return jnp.dot(h2.astype(wdt), w3, preferred_element_type=jnp.float32) + b3

    q1 = head(h1[:, :mid], p["w2_1"], p["b2_1"], p["w3_1"], p["b3_1"])
    q2 = head(h1[:, mid:], p["w2_2"], p["b2_2"], p["w3_2"], p["b3_2"])
    return q1, q2


def _choose_tile(b8, tb_max, mid_dim):
    # Cap the tile so the f32 (tb, 2*mid) hidden activation is ~1 MiB, keep at most
    # tb_max rows, and split batches > 8 rows into >= 2 grid steps so the batch axis
    # can shard across v7x's two TensorCores and DMA pipelining has work to overlap.
    cap = max(8, (((1 << 20) // max(1, 8 * mid_dim)) // 8) * 8)
    tb = min(tb_max, cap, _round_up(pl.cdiv(b8, 2), 8))
    return max(8, tb)


def critic_model_dist_forward(obs, act, prepared, *, tb_max=_TB_MAX, min_pallas_batch=0):
    """obs: (B, obs_dim), act: (B, act_dim) -> (q1, q2), each (B, act_dim) float32.

    `prepared` comes from prepare_critic_params().  Set min_pallas_batch to ~512 to
    route tiny rollout batches to the plain-XLA path (pallas_call fixed cost dominates
    there); default 0 always uses the kernel.
    """
    B, obs_dim = obs.shape
    act_dim = act.shape[1]
    mid_dim = prepared["w2_1"].shape[0]

    if B < min_pallas_batch:
        return _xla_forward(obs, act, prepared)

    wdt = prepared["w1o"].dtype
    obs = obs.astype(wdt)
    act = act.astype(wdt)

    b8 = _round_up(B, 8)
    tb = _choose_tile(b8, tb_max, mid_dim)
    b_pad = _round_up(b8, tb)
    if b_pad != B:
        obs = jnp.pad(obs, ((0, b_pad - B), (0, 0)))
        act = jnp.pad(act, ((0, b_pad - B), (0, 0)))

    const = lambda i: (0, 0)   # weights/biases: same block every step -> stay resident
    p = prepared
    in_specs = [
        pl.BlockSpec((tb, obs_dim), lambda i: (i, 0)),
        pl.BlockSpec((tb, act_dim), lambda i: (i, 0)),
        pl.BlockSpec(p["w1o"].shape, const),
        pl.BlockSpec(p["w1a"].shape, const),
        pl.BlockSpec(p["b1"].shape, const),
        pl.BlockSpec(p["w2_1"].shape, const),
        pl.BlockSpec(p["b2_1"].shape, const),
        pl.BlockSpec(p["w2_2"].shape, const),
        pl.BlockSpec(p["b2_2"].shape, const),
        pl.BlockSpec(p["w3_1"].shape, const),
        pl.BlockSpec(p["b3_1"].shape, const),
        pl.BlockSpec(p["w3_2"].shape, const),
        pl.BlockSpec(p["b3_2"].shape, const),
    ]
    out_spec = pl.BlockSpec((tb, act_dim), lambda i: (i, 0))

    q1, q2 = pl.pallas_call(
        _critic_kernel,
        out_shape=(jax.ShapeDtypeStruct((b_pad, act_dim), jnp.float32),
                   jax.ShapeDtypeStruct((b_pad, act_dim), jnp.float32)),
        grid=(b_pad // tb,),
        in_specs=in_specs,
        out_specs=(out_spec, out_spec),
        compiler_params=pltpu.CompilerParams(dimension_semantics=("parallel",)),
    )(obs, act,
      p["w1o"], p["w1a"], p["b1"],
      p["w2_1"], p["b2_1"], p["w2_2"], p["b2_2"],
      p["w3_1"], p["b3_1"], p["w3_2"], p["b3_2"])

    if b_pad != B:
        q1, q2 = q1[:B], q2[:B]
    return q1, q2


# --------------------------------------------------------------------------------------
# Init + full-f32 reference (matches the PyTorch module)
# --------------------------------------------------------------------------------------
def init_params(key, obs_dim, mid_dim, act_dim):
    """PyTorch-Linear-like init (uniform +/- 1/sqrt(fan_in)).

    Weights stored as (in_features, out_features); biases as (1, out_features).
    """
    in_dim = obs_dim + act_dim
    dims = [(in_dim, mid_dim), (mid_dim, mid_dim), (mid_dim, act_dim)]
    params = {}
    for net_name in ("net1", "net2"):
        net = {}
        for li, (fin, fout) in enumerate(dims, start=1):
            key, kw, kb = jax.random.split(key, 3)
            bound = 1.0 / jnp.sqrt(jnp.float32(fin))
            net[f"w{li}"] = jax.random.uniform(kw, (fin, fout), jnp.float32,
                                               minval=-bound, maxval=bound)
            net[f"b{li}"] = jax.random.uniform(kb, (1, fout), jnp.float32,
                                               minval=-bound, maxval=bound)
        params[net_name] = net
    return params


def reference_forward(obs, act, params):
    x = jnp.concatenate([obs, act], axis=1).astype(jnp.float32)

    def mlp(p):
        h1 = jnp.maximum(x @ p["w1"] + p["b1"], 0.0)
        h2 = jnp.maximum(h1 @ p["w2"] + p["b2"], 0.0)
        return h2 @ p["w3"] + p["b3"]

    return mlp(params["net1"]), mlp(params["net2"])


if __name__ == "__main__":
    # Small mujoco-like shapes.
    batch, obs_dim, act_dim, mid_dim = 8, 17, 6, 32

    key = jax.random.PRNGKey(0)
    k_obs, k_act, k_par = jax.random.split(key, 3)
    obs = jax.random.normal(k_obs, (batch, obs_dim), jnp.float32)
    act = jax.random.normal(k_act, (batch, act_dim), jnp.float32)
    params = init_params(k_par, obs_dim, mid_dim, act_dim)

    prepared = prepare_critic_params(params, obs_dim)   # hoisted out of the forward path
    fwd = jax.jit(critic_model_dist_forward)
    q1, q2 = fwd(obs, act, prepared)
    jax.block_until_ready((q1, q2))

    assert q1.shape == (batch, act_dim) and q2.shape == (batch, act_dim)

    # Exact-math check against the same bf16-cast weights on the plain-XLA path.
    m1, m2 = _xla_forward(obs, act, prepared)
    assert jnp.allclose(q1, m1, atol=1e-3, rtol=1e-3)
    assert jnp.allclose(q2, m2, atol=1e-3, rtol=1e-3)

    # Semantics check against the full-f32 PyTorch-equivalent reference (bf16 tolerance).
    r1, r2 = reference_forward(obs, act, params)
    assert jnp.allclose(q1, r1, atol=3e-2, rtol=3e-2)
    assert jnp.allclose(q2, r2, atol=3e-2, rtol=3e-2)

    # TODO(synk): use_dist=True (num_atoms>1) distributional head and get_probs()
    # softmax are outside forward() and not implemented here.
    print("KERNEL_OK")
</pallas_src>

<mosaic_0001>
module attributes {stable_mosaic.version = 11 : i64} {
  func.func @_critic_kernel(%arg0: i32, %arg1: memref<8x17xbf16, #tpu.memory_space<vmem>>, %arg2: memref<8x6xbf16, #tpu.memory_space<vmem>>, %arg3: memref<17x64xbf16, #tpu.memory_space<vmem>>, %arg4: memref<6x64xbf16, #tpu.memory_space<vmem>>, %arg5: memref<1x64xf32, #tpu.memory_space<vmem>>, %arg6: memref<32x32xbf16, #tpu.memory_space<vmem>>, %arg7: memref<1x32xf32, #tpu.memory_space<vmem>>, %arg8: memref<32x32xbf16, #tpu.memory_space<vmem>>, %arg9: memref<1x32xf32, #tpu.memory_space<vmem>>, %arg10: memref<32x6xbf16, #tpu.memory_space<vmem>>, %arg11: memref<1x6xf32, #tpu.memory_space<vmem>>, %arg12: memref<32x6xbf16, #tpu.memory_space<vmem>>, %arg13: memref<1x6xf32, #tpu.memory_space<vmem>>, %arg14: memref<8x6xf32, #tpu.memory_space<vmem>>, %arg15: memref<8x6xf32, #tpu.memory_space<vmem>>) attributes {dimension_semantics = [#tpu.dimension_semantics<parallel>], iteration_bounds = array<i64: 1>, scalar_prefetch = 0 : i64, scratch_operands = 0 : i64, tpu.core_type = #tpu.core_type<tc>, window_params = [{transform_indices = @transform_0, window_bounds = array<i64: 8, 17>}, {transform_indices = @transform_1, window_bounds = array<i64: 8, 6>}, {pipeline_mode = #tpu.pipeline_mode<synchronous>, transform_indices = @transform_2, window_bounds = array<i64: 17, 64>}, {pipeline_mode = #tpu.pipeline_mode<synchronous>, transform_indices = @transform_3, window_bounds = array<i64: 6, 64>}, {pipeline_mode = #tpu.pipeline_mode<synchronous>, transform_indices = @transform_4, window_bounds = array<i64: 1, 64>}, {pipeline_mode = #tpu.pipeline_mode<synchronous>, transform_indices = @transform_5, window_bounds = array<i64: 32, 32>}, {pipeline_mode = #tpu.pipeline_mode<synchronous>, transform_indices = @transform_6, window_bounds = array<i64: 1, 32>}, {pipeline_mode = #tpu.pipeline_mode<synchronous>, transform_indices = @transform_7, window_bounds = array<i64: 32, 32>}, {pipeline_mode = #tpu.pipeline_mode<synchronous>, transform_indices = @transform_8, window_bounds = array<i64: 1, 32>}, {pipeline_mode = #tpu.pipeline_mode<synchronous>, transform_indices = @transform_9, window_bounds = array<i64: 32, 6>}, {pipeline_mode = #tpu.pipeline_mode<synchronous>, transform_indices = @transform_10, window_bounds = array<i64: 1, 6>}, {pipeline_mode = #tpu.pipeline_mode<synchronous>, transform_indices = @transform_11, window_bounds = array<i64: 32, 6>}, {pipeline_mode = #tpu.pipeline_mode<synchronous>, transform_indices = @transform_12, window_bounds = array<i64: 1, 6>}, {transform_indices = @transform_13, window_bounds = array<i64: 8, 6>}, {transform_indices = @transform_14, window_bounds = array<i64: 8, 6>}]} {
    %c0 = arith.constant 0 : index
    %c0_0 = arith.constant 0 : index
    %0 = vector.load %arg1[%c0, %c0_0] : memref<8x17xbf16, #tpu.memory_space<vmem>>, vector<8x17xbf16>
    %c0_1 = arith.constant 0 : index
    %c0_2 = arith.constant 0 : index
    %1 = vector.load %arg3[%c0_1, %c0_2] : memref<17x64xbf16, #tpu.memory_space<vmem>>, vector<17x64xbf16>
    %cst = arith.constant dense<0.000000e+00> : vector<8x64xf32>
    %2 = tpu.matmul %0, %1, %cst {dimension_numbers = #tpu.dot_dimension_numbers<[1], [0], [0], [1], [0, 0, 1, 1], [], []>} : vector<8x17xbf16>, vector<17x64xbf16>, vector<8x64xf32> -> vector<8x64xf32>
    %c0_3 = arith.constant 0 : index
    %c0_4 = arith.constant 0 : index
    %3 = vector.load %arg2[%c0_3, %c0_4] : memref<8x6xbf16, #tpu.memory_space<vmem>>, vector<8x6xbf16>
    %c0_5 = arith.constant 0 : index
    %c0_6 = arith.constant 0 : index
    %4 = vector.load %arg4[%c0_5, %c0_6] : memref<6x64xbf16, #tpu.memory_space<vmem>>, vector<6x64xbf16>
    %cst_7 = arith.constant dense<0.000000e+00> : vector<8x64xf32>
    %5 = tpu.matmul %3, %4, %cst_7 {dimension_numbers = #tpu.dot_dimension_numbers<[1], [0], [0], [1], [0, 0, 1, 1], [], []>} : vector<8x6xbf16>, vector<6x64xbf16>, vector<8x64xf32> -> vector<8x64xf32>
    %6 = arith.addf %2, %5 : vector<8x64xf32>
    %c0_8 = arith.constant 0 : index
    %c0_9 = arith.constant 0 : index
    %7 = vector.load %arg5[%c0_8, %c0_9] : memref<1x64xf32, #tpu.memory_space<vmem>>, vector<1x64xf32>
    %8 = vector.broadcast %7 : vector<1x64xf32> to vector<8x64xf32>
    %9 = arith.addf %6, %8 : vector<8x64xf32>
    %cst_10 = arith.constant 0.000000e+00 : f32
    %10 = vector.broadcast %cst_10 : f32 to vector<8x64xf32>
    %11 = arith.maximumf %9, %10 : vector<8x64xf32>
    %12 = vector.extract_strided_slice %11 {offsets = [0, 0], sizes = [8, 32], strides = [1, 1]} : vector<8x64xf32> to vector<8x32xf32>
    %13 = arith.truncf %12 : vector<8x32xf32> to vector<8x32xbf16>
    %14 = vector.extract_strided_slice %11 {offsets = [0, 32], sizes = [8, 32], strides = [1, 1]} : vector<8x64xf32> to vector<8x32xf32>
    %15 = arith.truncf %14 : vector<8x32xf32> to vector<8x32xbf16>
    %c0_11 = arith.constant 0 : index
    %c0_12 = arith.constant 0 : index
    %16 = vector.load %arg6[%c0_11, %c0_12] : memref<32x32xbf16, #tpu.memory_space<vmem>>, vector<32x32xbf16>
    %cst_13 = arith.constant dense<0.000000e+00> : vector<8x32xf32>
    %17 = tpu.matmul %13, %16, %cst_13 {dimension_numbers = #tpu.dot_dimension_numbers<[1], [0], [0], [1], [0, 0, 1, 1], [], []>} : vector<8x32xbf16>, vector<32x32xbf16>, vector<8x32xf32> -> vector<8x32xf32>
    %c0_14 = arith.constant 0 : index
    %c0_15 = arith.constant 0 : index
    %18 = vector.load %arg7[%c0_14, %c0_15] : memref<1x32xf32, #tpu.memory_space<vmem>>, vector<1x32xf32>
    %19 = vector.broadcast %18 : vector<1x32xf32> to vector<8x32xf32>
    %20 = arith.addf %17, %19 : vector<8x32xf32>
    %cst_16 = arith.constant 0.000000e+00 : f32
    %21 = vector.broadcast %cst_16 : f32 to vector<8x32xf32>
    %22 = arith.maximumf %20, %21 : vector<8x32xf32>
    %c0_17 = arith.constant 0 : index
    %c0_18 = arith.constant 0 : index
    %23 = vector.load %arg8[%c0_17, %c0_18] : memref<32x32xbf16, #tpu.memory_space<vmem>>, vector<32x32xbf16>
    %cst_19 = arith.constant dense<0.000000e+00> : vector<8x32xf32>
    %24 = tpu.matmul %15, %23, %cst_19 {dimension_numbers = #tpu.dot_dimension_numbers<[1], [0], [0], [1], [0, 0, 1, 1], [], []>} : vector<8x32xbf16>, vector<32x32xbf16>, vector<8x32xf32> -> vector<8x32xf32>
    %c0_20 = arith.constant 0 : index
    %c0_21 = arith.constant 0 : index
    %25 = vector.load %arg9[%c0_20, %c0_21] : memref<1x32xf32, #tpu.memory_space<vmem>>, vector<1x32xf32>
    %26 = vector.broadcast %25 : vector<1x32xf32> to vector<8x32xf32>
    %27 = arith.addf %24, %26 : vector<8x32xf32>
    %cst_22 = arith.constant 0.000000e+00 : f32
    %28 = vector.broadcast %cst_22 : f32 to vector<8x32xf32>
    %29 = arith.maximumf %27, %28 : vector<8x32xf32>
    %30 = arith.truncf %22 : vector<8x32xf32> to vector<8x32xbf16>
    %c0_23 = arith.constant 0 : index
    %c0_24 = arith.constant 0 : index
    %31 = vector.load %arg10[%c0_23, %c0_24] : memref<32x6xbf16, #tpu.memory_space<vmem>>, vector<32x6xbf16>
    %cst_25 = arith.constant dense<0.000000e+00> : vector<8x6xf32>
    %32 = tpu.matmul %30, %31, %cst_25 {dimension_numbers = #tpu.dot_dimension_numbers<[1], [0], [0], [1], [0, 0, 1, 1], [], []>} : vector<8x32xbf16>, vector<32x6xbf16>, vector<8x6xf32> -> vector<8x6xf32>
    %c0_26 = arith.constant 0 : index
    %c0_27 = arith.constant 0 : index
    %33 = vector.load %arg11[%c0_26, %c0_27] : memref<1x6xf32, #tpu.memory_space<vmem>>, vector<1x6xf32>
    %34 = vector.broadcast %33 : vector<1x6xf32> to vector<8x6xf32>
    %35 = arith.addf %32, %34 : vector<8x6xf32>
    %c0_28 = arith.constant 0 : index
    %c0_29 = arith.constant 0 : index
    %36 = vector.load %arg14[%c0_28, %c0_29] : memref<8x6xf32, #tpu.memory_space<vmem>>, vector<8x6xf32>
    tpu.vector_store %arg14[%c0_28, %c0_29], %35 {strides = array<i32>} : memref<8x6xf32, #tpu.memory_space<vmem>>, vector<8x6xf32>,
    %37 = arith.truncf %29 : vector<8x32xf32> to vector<8x32xbf16>
    %c0_30 = arith.constant 0 : index
    %c0_31 = arith.constant 0 : index
    %38 = vector.load %arg12[%c0_30, %c0_31] : memref<32x6xbf16, #tpu.memory_space<vmem>>, vector<32x6xbf16>
    %cst_32 = arith.constant dense<0.000000e+00> : vector<8x6xf32>
    %39 = tpu.matmul %37, %38, %cst_32 {dimension_numbers = #tpu.dot_dimension_numbers<[1], [0], [0], [1], [0, 0, 1, 1], [], []>} : vector<8x32xbf16>, vector<32x6xbf16>, vector<8x6xf32> -> vector<8x6xf32>
    %c0_33 = arith.constant 0 : index
    %c0_34 = arith.constant 0 : index
    %40 = vector.load %arg13[%c0_33, %c0_34] : memref<1x6xf32, #tpu.memory_space<vmem>>, vector<1x6xf32>
    %41 = vector.broadcast %40 : vector<1x6xf32> to vector<8x6xf32>
    %42 = arith.addf %39, %41 : vector<8x6xf32>
    %c0_35 = arith.constant 0 : index
    %c0_36 = arith.constant 0 : index
    %43 = vector.load %arg15[%c0_35, %c0_36] : memref<8x6xf32, #tpu.memory_space<vmem>>, vector<8x6xf32>
    tpu.vector_store %arg15[%c0_35, %c0_36], %42 {strides = array<i32>} : memref<8x6xf32, #tpu.memory_space<vmem>>, vector<8x6xf32>,
    return
  }
  func.func @transform_0(%arg0: i32) -> (i32, i32) {
    %c0_i32 = arith.constant 0 : i32
    %c0_i32_0 = arith.constant 0 : i32
    return %arg0, %c0_i32 : i32, i32
  }
  func.func @transform_1(%arg0: i32) -> (i32, i32) {
    %c0_i32 = arith.constant 0 : i32
    %c0_i32_0 = arith.constant 0 : i32
    return %arg0, %c0_i32 : i32, i32
  }
  func.func @transform_2(%arg0: i32) -> (i32, i32) {
    %c0_i32 = arith.constant 0 : i32
    %c0_i32_0 = arith.constant 0 : i32
    %c0_i32_1 = arith.constant 0 : i32
    return %c0_i32, %c0_i32_0 : i32, i32
  }
  func.func @transform_3(%arg0: i32) -> (i32, i32) {
    %c0_i32 = arith.constant 0 : i32
    %c0_i32_0 = arith.constant 0 : i32
    %c0_i32_1 = arith.constant 0 : i32
    return %c0_i32, %c0_i32_0 : i32, i32
  }
  func.func @transform_4(%arg0: i32) -> (i32, i32) {
    %c0_i32 = arith.constant 0 : i32
    %c0_i32_0 = arith.constant 0 : i32
    %c0_i32_1 = arith.constant 0 : i32
    return %c0_i32, %c0_i32_0 : i32, i32
  }
  func.func @transform_5(%arg0: i32) -> (i32, i32) {
    %c0_i32 = arith.constant 0 : i32
    %c0_i32_0 = arith.constant 0 : i32
    %c0_i32_1 = arith.constant 0 : i32
    return %c0_i32, %c0_i32_0 : i32, i32
  }
  func.func @transform_6(%arg0: i32) -> (i32, i32) {
    %c0_i32 = arith.constant 0 : i32
    %c0_i32_0 = arith.constant 0 : i32
    %c0_i32_1 = arith.constant 0 : i32
    return %c0_i32, %c0_i32_0 : i32, i32
  }
  func.func @transform_7(%arg0: i32) -> (i32, i32) {
    %c0_i32 = arith.constant 0 : i32
    %c0_i32_0 = arith.constant 0 : i32
    %c0_i32_1 = arith.constant 0 : i32
    return %c0_i32, %c0_i32_0 : i32, i32
  }
  func.func @transform_8(%arg0: i32) -> (i32, i32) {
    %c0_i32 = arith.constant 0 : i32
    %c0_i32_0 = arith.constant 0 : i32
    %c0_i32_1 = arith.constant 0 : i32
    return %c0_i32, %c0_i32_0 : i32, i32
  }
  func.func @transform_9(%arg0: i32) -> (i32, i32) {
    %c0_i32 = arith.constant 0 : i32
    %c0_i32_0 = arith.constant 0 : i32
    %c0_i32_1 = arith.constant 0 : i32
    return %c0_i32, %c0_i32_0 : i32, i32
  }
  func.func @transform_10(%arg0: i32) -> (i32, i32) {
    %c0_i32 = arith.constant 0 : i32
    %c0_i32_0 = arith.constant 0 : i32
    %c0_i32_1 = arith.constant 0 : i32
    return %c0_i32, %c0_i32_0 : i32, i32
  }
  func.func @transform_11(%arg0: i32) -> (i32, i32) {
    %c0_i32 = arith.constant 0 : i32
    %c0_i32_0 = arith.constant 0 : i32
    %c0_i32_1 = arith.constant 0 : i32
    return %c0_i32, %c0_i32_0 : i32, i32
  }
  func.func @transform_12(%arg0: i32) -> (i32, i32) {
    %c0_i32 = arith.constant 0 : i32
    %c0_i32_0 = arith.constant 0 : i32
    %c0_i32_1 = arith.constant 0 : i32
    return %c0_i32, %c0_i32_0 : i32, i32
  }
  func.func @transform_13(%arg0: i32) -> (i32, i32) {
    %c0_i32 = arith.constant 0 : i32
    %c0_i32_0 = arith.constant 0 : i32
    return %arg0, %c0_i32 : i32, i32
  }
  func.func @transform_14(%arg0: i32) -> (i32, i32) {
    %c0_i32 = arith.constant 0 : i32
    %c0_i32_0 = arith.constant 0 : i32
    return %arg0, %c0_i32 : i32, i32
  }
}

</mosaic_0001>

<bundles_post_ra>
// kernel: critic_model_dist_forward.1
= control target key start
LH: loop header
LB: loop body
LE: loop exit
PB: predicated region body
PF: predicated region fallthrough
CT: control target
= control target key end

     0   :  { %20 = vsyncpa [#allocation3], 0  ;;  %vm59_vm0 = vcmask 1042432   ;;  %vm116_vm1 = vcmask 1040384   ;;  %v618_v1 = vmov 0.0   ;;  %vm619_vm2 = vmmov 0   ;;  %s789_s0 = inlined_call_operand.vmem [shape: bf16[8,17], index: 0, kind: input, shape index: {}]   ;;  %s790_s1 = inlined_call_operand.vmem [shape: bf16[8,6], index: 1, kind: input, shape index: {}]   ;;  %s791_s2 = inlined_call_operand.vmem [shape: bf16[17,64], index: 2, kind: input, shape index: {}]   ;;  %s792_s3 = inlined_call_operand.vmem [shape: bf16[6,64], index: 3, kind: input, shape index: {}]   ;;  %s793_s4 = inlined_call_operand.vmem [shape: f32[1,64], index: 4, kind: input, shape index: {}]   ;;  %s794_s5 = inlined_call_operand.vmem [shape: bf16[32,32], index: 5, kind: input, shape index: {}]   ;;  %s795_s6 = inlined_call_operand.vmem [shape: f32[1,32], index: 6, kind: input, shape index: {}]   ;;  %s796_s7 = inlined_call_operand.vmem [shape: bf16[32,32], index: 7, kind: input, shape index: {}]   ;;  %s797_s8 = inlined_call_operand.vmem [shape: f32[1,32], index: 8, kind: input, shape index: {}]   ;;  %s798_s9 = inlined_call_operand.vmem [shape: bf16[32,6], index: 9, kind: input, shape index: {}]   ;;  %s799_s10 = inlined_call_operand.vmem [shape: f32[1,6], index: 10, kind: input, shape index: {}]   ;;  %s800_s11 = inlined_call_operand.vmem [shape: bf16[32,6], index: 11, kind: input, shape index: {}]   ;;  %s801_s12 = inlined_call_operand.vmem [shape: f32[1,6], index: 12, kind: input, shape index: {}]   ;;  %s802_s13 = inlined_call_operand.hbm [shape: f32[8,6], index: 13, kind: output, shape index: {0}]   ;;  %s803_s14 = inlined_call_operand.hbm [shape: f32[8,6], index: 14, kind: output, shape index: {1}]  }
   0x1   :  { %v54_v0 = vld [vmem:[%s792_s3] sm:$0x7]  ;;  %512 = vmatprep.subr.bf16.mxu0 %v618_v1  ;;  %518 = vmatprep.subr.bf16.mxu1 %v618_v1  ;;  %v564_v3 = vld [vmem:[%s791_s2 + $0x8] ss:$0 sps:$4 sm:$0x11]   ;;  %vm55_vm3 = vcmask 48128  }
   0x2   :  { %v61_v2 = vsel %vm59_vm0, %v54_v0, 0  ;;  %514 = vmatprep.mubr.msk.bf16.mxu0 %vm619_vm2, %v618_v1  ;;  %v53_v4 = vld [vmem:[%s790_s1] sm:$0xf]  ;;  %v620_v5 = vmov 0   ;;  %522 = vmatprep.mubr.msk.bf16.mxu1 %vm619_vm2, %v618_v1 }
   0x3   :  { %513 = vmatpush3.bf16.msra.mxu0 %v61_v2  ;;  %v118_v6 = vsel %vm116_vm1, 65535, %v620_v5  ;;  %v565_v8 = vld [vmem:[%s791_s2] sm:$0xff]  }
   0x4   :  { %526 = vmatprep.subr.bf16.mxu0 %v618_v1  ;;  %v120_v7 = vand.u32 %v564_v3, %v118_v6 }
   0x6   :  { %515 = vmatmul.mubr.msk.bf16.vlgmr.msra.gmra.mxu0 %vm55_vm3, %v53_v4  ;;  %519 = vmatpush3.bf16.msra.mxu1 %v120_v7 }
   0x7   :  { %530 = vmatprep.mubr.msk.bf16.mxu0 %vm619_vm2, %v618_v1  ;;  %520 = vmatprep.subr.bf16.mxu1 %v618_v1 }
   0x8   :  { %21 = vsyncpa [#allocation5], 0  ;;  %v49_v9 = vld [vmem:[%s789_s0] sm:$0xf]  ;;  %vm112_vm4 = vcmask 138240   ;;  %v566_v10 = vld [vmem:[%s794_s5 + $0x8] sm:$0xff]  }
   0x9   :  { %527 = vmatpush3.bf16.msra.mxu0 %v566_v10  ;;  %v567_v11 = vld [vmem:[%s794_s5] sm:$0xff]   ;;  %v568_v12 = vld [vmem:[%s796_s7 + $0x8] sm:$0xff]   ;;  %vm195_vm5 = vcmask 261120   ;;  %s622_s20 = smov [#allocation2]  }
   0xa   :  { %521 = vmatpush3.bf16.msra.mxu1 %v565_v8  ;;  %528 = vmatprep.subr.bf16.mxu0 %v618_v1  ;;  %v569_v13 = vld [vmem:[%s796_s7] sm:$0xff]   ;;  %s621_s7 = smov 96   ;;  %v570_v27 = vld [vmem:[%s798_s9 + $0x8] sm:$0xff]   ;;  %s452_s2 = sshll.u32 %s622_s20, 4  ;;  %s453_s2 = int_to_ptr.vmem [resolvable:$true] %s452_s2 }
   0xb   :  { %534 = vmatprep.subr.bf16.mxu1 %v618_v1  ;;  %v478_v19 = vld [vmem:[%s793_s4] ss:$0 sm:$0xff]  ;;  %v572_v29 = vld [vmem:[%s800_s11 + $0x8] sm:$0xff]   ;;  %p579_p1 = scmp.lt.s32.totalorder %s453_s2, %s453_s2 }
   0xc   :  { %v571_v28 = vld [vmem:[%s798_s9] sm:$0xff]  }
   0xd   :  { %523 = vmatmul.mubr.msk.bf16.vlgmr.msra.gmra.mxu1 %vm112_vm4, %v49_v9  ;;  %529 = vmatpush3.bf16.msra.mxu0 %v567_v11  ;;  %v573_v31 = vld [vmem:[%s800_s11] sm:$0xff]  }
   0xe   :  { %538 = vmatprep.mubr.msk.bf16.mxu1 %vm619_vm2, %v618_v1  ;;  %542 = vmatprep.subr.bf16.mxu0 %v618_v1  ;;  %v479_v32 = vld [vmem:[%s795_s6] ss:$0 sm:$0xff] }
   0xf   :  { %535 = vmatpush3.bf16.msra.mxu1 %v568_v12  ;;  %v483_v40 = vld [vmem:[%s797_s8] ss:$0 sm:$0xff]  ;;  %s574_s8 = scalar_lea.vmem %s453_s2, 128 }
  0x10   :  { %536 = vmatprep.subr.bf16.mxu1 %v618_v1  ;;  %v487_v48 = vld [vmem:[%s799_s10] ss:$0 sm:$0xff]  ;;  %p575_p0 = scmp.ne.s32.totalorder %s453_s2, %s574_s8  ;;  %p580_p2 = scmp.lt.s32.totalorder %s574_s8, %s574_s8 }
  0x12   :  { %p581_p3 = por %p580_p2, %p579_p1 }
  0x13   :  { %537 = vmatpush3.bf16.msra.mxu1 %v569_v13 }
  0x14   :  { %550 = vmatprep.subr.bf16.mxu1 %v618_v1  ;;  %p582_p4 = pnand %p581_p3, %p575_p0 }
  0xc6   :  { %v97_v14 = vpop.f32.mrf.mxu0 }
  0xc8   :  { %v516_v15 = vpop.f32.mrf.mxu0 }
  0xca   :  { %v100_v16 = vpop.f32.mrf.mxu0 }
  0xcc   :  { %v517_v17 = vpop.f32.mrf.mxu0 }
  0xcd   :  { %v156_v18 = vpop.f32.mrf.mxu1 }
  0xce   :  { %v157_v20 = vadd.f32 %v156_v18, %v97_v14 }
  0xcf   :  { %v524_v21 = vpop.f32.mrf.mxu1 }
  0xd0   :  { %v169_v22 = vadd.f32 %v478_v19, %v157_v20 }
  0xd1   :  { %v159_v23 = vpop.f32.mrf.mxu1 }
  0xd2   :  { %v170_v24 = vmax.f32 %v169_v22, 0.0 }
  0xd3   :  { %v525_v25 = vpop.f32.mrf.mxu1 }
  0xd4   :  { %v171_v26 = vpack.c.bf16 %v170_v24, %v170_v24 }
  0xd6   :  { %531 = vmatmul.mubr.msk.bf16.vlgmr.msra.gmra.mxu0 %vm195_vm5, %v171_v26  ;;  %252 = vrot.lane.b32.xlu0 %v171_v26, %s621_s7 }
  0xd7   :  { %546 = vmatprep.mubr.msk.bf16.mxu0 %vm619_vm2, %v618_v1  ;;  %543 = vmatpush3.bf16.msra.mxu0 %v570_v27 }
  0xd8   :  { %544 = vmatprep.subr.bf16.mxu0 %v618_v1 }
  0xdb   :  { %545 = vmatpush3.bf16.msra.mxu0 %v571_v28 }
 0x148   :  { %v253_v30 = vpop.permute.xlu0 %252 }
 0x149   :  { %539 = vmatmul.mubr.msk.bf16.vlgmr.msra.gmra.mxu1 %vm195_vm5, %v253_v30 }
 0x14a   :  { %551 = vmatpush3.bf16.msra.mxu1 %v572_v29  ;;  %554 = vmatprep.mubr.msk.bf16.mxu1 %vm619_vm2, %v618_v1 }
 0x14b   :  { %552 = vmatprep.subr.bf16.mxu1 %v618_v1 }
 0x14e   :  { %553 = vmatpush3.bf16.msra.mxu1 %v573_v31 }
 0x196   :  { %v233_v33 = vpop.f32.mrf.mxu0 }
 0x197   :  { %v234_v34 = vadd.f32 %v479_v32, %v233_v33 }
 0x198   :  { %v532_v35 = vpop.f32.mrf.mxu0 }
 0x199   :  { %v239_v36 = vmax.f32 %v234_v34, 0.0 }
 0x19a   :  { %v236_v37 = vpop.f32.mrf.mxu0 }
 0x19b   :  { %v310_v38 = vpack.c.bf16 %v239_v36, %v239_v36 }
 0x19c   :  { %v533_v39 = vpop.f32.mrf.mxu0 }
 0x19d   :  { %547 = vmatmul.mubr.msk.bf16.vlgmr.msra.gmra.mxu0 %vm195_vm5, %v310_v38 }
 0x209   :  { %v303_v41 = vpop.f32.mrf.mxu1 }
 0x20a   :  { %v304_v42 = vadd.f32 %v483_v40, %v303_v41 }
 0x20b   :  { %v540_v43 = vpop.f32.mrf.mxu1 }
 0x20c   :  { %v309_v44 = vmax.f32 %v304_v42, 0.0 }
 0x20d   :  { %v306_v45 = vpop.f32.mrf.mxu1 }
 0x20e   :  { %v378_v46 = vpack.c.bf16 %v309_v44, %v309_v44 }
 0x20f   :  { %v541_v47 = vpop.f32.mrf.mxu1 }
 0x210   :  { %555 = vmatmul.mubr.msk.bf16.vlgmr.msra.gmra.mxu1 %vm195_vm5, %v378_v46 }
 0x25d   :  { %v371_v49 = vpop.f32.mrf.mxu0 }
 0x25e   :  { %v372_v50 = vadd.f32 %v487_v48, %v371_v49 }
 0x25f   :  { %v548_v51 = vpop.f32.mrf.mxu0 }
 0x260   :  { %377 = vst.msk [vmem:[#allocation2] sm:$0xff] %vm55_vm3, %v372_v50 }
 0x261   :  { %v374_v52 = vpop.f32.mrf.mxu0 }
 0x262   :  { %585 = shalt.err (!%p582_p4)
}
 0x263   :  { %455 = dma.vmem_to_hbm [thread:$0]  %s453_s2, 128, %s802_s13, [#allocation3]   ;;  %v549_v53 = vpop.f32.mrf.mxu0  ;;  %v491_v54 = vld [vmem:[%s801_s12] ss:$0 sm:$0xff] }
 0x264   :  { %s623_s0 = smov [#allocation4]  }
 0x265   :  { %s462_s24 = sshll.u32 %s623_s0, 4  ;;  %s463_s24 = int_to_ptr.vmem [resolvable:$true] %s462_s24 }
 0x266   :  { %s594_s25 = scalar_lea.vmem %s463_s24, 128  ;;  %p599_p6 = scmp.lt.s32.totalorder %s463_s24, %s463_s24 }
 0x267   :  { %p595_p5 = scmp.ne.s32.totalorder %s463_s24, %s594_s25  ;;  %p600_p7 = scmp.lt.s32.totalorder %s594_s25, %s594_s25 }
 0x269   :  { %p601_p8 = por %p600_p7, %p599_p6 }
 0x26b   :  { %p602_p9 = pnand %p601_p8, %p595_p5 }
 0x2d0   :  { %v439_v55 = vpop.f32.mrf.mxu1 }
 0x2d1   :  { %v440_v56 = vadd.f32 %v491_v54, %v439_v55 }
 0x2d2   :  { %v556_v57 = vpop.f32.mrf.mxu1 }
 0x2d3   :  { %445 = vst.msk [vmem:[#allocation4] sm:$0xff] %vm55_vm3, %v440_v56 }
 0x2d4   :  { %v442_v58 = vpop.f32.mrf.mxu1 }
 0x2d5   :  { %605 = shalt.err (!%p602_p9)
}
 0x2d6   :  { %465 = dma.vmem_to_hbm [thread:$0]  %s463_s24, 128, %s803_s14, [#allocation5]   ;;  %v557_v59 = vpop.f32.mrf.mxu1 }
 0x2d7   :  { %614 = dma.done.wait [#allocation3], 128  }
 0x2d8   :  { %615 = vsyncadd [#allocation3], 4294967168 }
 0x2d9   :  { %616 = dma.done.wait [#allocation5], 128  }
 0x2da   :  { %617 = vsyncadd [#allocation5], 4294967168 }
 0x2db   :  { %472 = vsyncpa [#allocation3], 1 }
 0x2dc   :  { %473 = vsyncpa [#allocation5], 1 }

</bundles_post_ra>
